<compile_context>
chip_gen: v7x
topology: tpu7x:2x2x1
jax: 0.10.0
libtpu: 0.0.40
codegen_flags: <defaults>
</compile_context>

<pallas_src>
import functools

import jax
import jax.numpy as jnp
from jax.experimental import pallas as pl
from jax.experimental.pallas import tpu as pltpu


def _round_up(n, m):
    return ((n + m - 1) // m) * m


# ----------------------------------------------------------------------------
# Fused Pallas kernel: res5 (1x1 conv + ReLU) -> spatial mean -> L2 norm ->
# cosine logits -> masked softmax.
# ----------------------------------------------------------------------------
def _make_fused_kernel(TR, PP, K):
    def kernel(x_ref, w_ref, b_ref, txt_ref, o_ref):
        # x:   (TR*PP, C_pad) bf16   ROI-pooled features, channels-last rows
        # w:   (C_pad, D_pad) bf16   synthetic res5 1x1-conv weight
        # b:   (1, D_pad)     f32    synthetic res5 bias
        # txt: (D_pad, K_pad) bf16   L2-normalized text table * exp(logit_scale)
        # o:   (TR, K_pad)    f32    softmax probabilities
        h = jnp.dot(x_ref[...], w_ref[...],
                    preferred_element_type=jnp.float32)        # MXU, f32 acc
        h = jnp.maximum(h + b_ref[...], 0.0)                   # VPU (f32)

        # spatial mean over the PP rows of each ROI (sublane reduce, no matmul)
        d_pad = h.shape[-1]
        feats = jnp.sum(h.reshape(TR, PP, d_pad), axis=1) * (1.0 / PP)

        # L2 normalize (eps avoids NaN for all-zero rows after ReLU)
        inv_norm = jax.lax.rsqrt(
            jnp.sum(feats * feats, axis=-1, keepdims=True) + 1e-12)
        feats = (feats * inv_norm).astype(txt_ref.dtype)

        # scaled cosine logits (scale already folded into txt table)
        logits = jnp.dot(feats, txt_ref[...],
                         preferred_element_type=jnp.float32)   # (TR, K_pad)

        # mask padded class columns, then stable softmax
        col = jax.lax.broadcasted_iota(jnp.int32, logits.shape, 1)
        logits = jnp.where(col < K, logits, -1e30)
        m = jnp.max(logits, axis=-1, keepdims=True)
        e = jnp.exp(logits - m)
        denom = jnp.sum(e, axis=-1, keepdims=True)
        o_ref[...] = e * pl.reciprocal(denom, approx=True)

    return kernel


def fused_res5_pool_classify(x, w, b, txt_t, *, TR, PP, K):
    # x:     (R_pad*PP, C_pad) bf16
    # w:     (C_pad, D_pad)    bf16
    # b:     (1, D_pad)        f32
    # txt_t: (D_pad, K_pad)    bf16
    rpp, c_pad = x.shape
    r_pad = rpp // PP
    d_pad = w.shape[1]
    k_pad = txt_t.shape[1]
    grid = (r_pad // TR,)
    kernel = _make_fused_kernel(TR, PP, K)
    return pl.pallas_call(
        kernel,
        out_shape=jax.ShapeDtypeStruct((r_pad, k_pad), jnp.float32),
        grid=grid,
        in_specs=[
            pl.BlockSpec((TR * PP, c_pad), lambda i: (i, 0)),
            pl.BlockSpec((c_pad, d_pad), lambda i: (0, 0)),
            pl.BlockSpec((1, d_pad), lambda i: (0, 0)),
            pl.BlockSpec((d_pad, k_pad), lambda i: (0, 0)),
        ],
        out_specs=pl.BlockSpec((TR, k_pad), lambda i: (i, 0)),
        compiler_params=pltpu.CompilerParams(
            dimension_semantics=("parallel",)),
    )(x, w, b, txt_t)


# ----------------------------------------------------------------------------
# ROIAlign glue (plain JAX): one bilinear sample per bin, aligned=True.
# Gathers only the 4*P*P corner points per ROI (no (R, C, H, W) duplication)
# and returns channels-last (R, P, P, C), ready for the kernel.
# ----------------------------------------------------------------------------
def roi_align(features, boxes, batch_idx, output_size, spatial_scale):
    B, C, H, W = features.shape
    P = output_size
    feat = jnp.transpose(features, (0, 2, 3, 1))               # (B, H, W, C)

    x1 = boxes[:, 0] * spatial_scale - 0.5
    y1 = boxes[:, 1] * spatial_scale - 0.5
    x2 = boxes[:, 2] * spatial_scale - 0.5
    y2 = boxes[:, 3] * spatial_scale - 0.5
    bin_w = (x2 - x1) / P
    bin_h = (y2 - y1) / P
    centers = jnp.arange(P, dtype=jnp.float32) + 0.5
    sx = x1[:, None] + centers[None, :] * bin_w[:, None]       # (R, P)
    sy = y1[:, None] + centers[None, :] * bin_h[:, None]       # (R, P)

    y = jnp.clip(sy, 0.0, H - 1.0)
    x = jnp.clip(sx, 0.0, W - 1.0)
    y0 = jnp.floor(y).astype(jnp.int32)
    x0 = jnp.floor(x).astype(jnp.int32)
    y1i = jnp.minimum(y0 + 1, H - 1)
    x1i = jnp.minimum(x0 + 1, W - 1)
    wy = (y - y0.astype(jnp.float32))[:, :, None, None]        # (R, P, 1, 1)
    wx = (x - x0.astype(jnp.float32))[:, None, :, None]        # (R, 1, P, 1)
    bi = batch_idx[:, None, None]                              # (R, 1, 1)

    def g(yi, xi):
        return feat[bi, yi[:, :, None], xi[:, None, :]]        # (R, P, P, C)

    return (g(y0, x0) * (1.0 - wy) * (1.0 - wx)
            + g(y0, x1i) * (1.0 - wy) * wx
            + g(y1i, x0) * wy * (1.0 - wx)
            + g(y1i, x1i) * wy * wx)


# ----------------------------------------------------------------------------
# CLIPRes5ROIHeads.forward equivalent
# ----------------------------------------------------------------------------
def clip_res5_roi_heads_forward(features, boxes, batch_idx, params,
                                pooler_resolution, stride):
    # pooler(features, proposal_boxes) -> (R, P, P, C) channels-last
    pooled = roi_align(features, boxes, batch_idx,
                       pooler_resolution, 1.0 / stride)
    R, Ph, Pw, C = pooled.shape
    PP = Ph * Pw
    D = params["res5_w"].shape[1]
    K = params["text_features"].shape[0]

    TR = 8                                   # ROIs per grid step (sublane tile)
    C_pad = _round_up(C, 128)
    D_pad = _round_up(D, 128)
    K_pad = _round_up(K, 128)
    R_pad = _round_up(R, TR)

    # Lane-dense, bf16 matmul operands (accumulation stays f32 in-kernel).
    x = pooled.reshape(R * PP, C)
    x = jnp.pad(x, ((0, (R_pad - R) * PP), (0, C_pad - C))).astype(jnp.bfloat16)
    w = jnp.pad(params["res5_w"],
                ((0, C_pad - C), (0, D_pad - D))).astype(jnp.bfloat16)
    b = jnp.pad(params["res5_b"].astype(jnp.float32),
                ((0, 0), (0, D_pad - D)))

    # Hoisted constants: L2-normalize text features once, fold exp(logit_scale)
    # into the table, transpose to (D, K) so the kernel's dot RHS is ready.
    txt = params["text_features"].astype(jnp.float32)
    txt = txt * jax.lax.rsqrt(jnp.sum(txt * txt, axis=1, keepdims=True) + 1e-12)
    txt = txt * jnp.exp(params["logit_scale"])
    txt_t = jnp.pad(txt.T, ((0, D_pad - D), (0, K_pad - K))).astype(jnp.bfloat16)

    probs = fused_res5_pool_classify(x, w, b, txt_t, TR=TR, PP=PP, K=K)
    return probs[:R, :K]


# ----------------------------------------------------------------------------
# Pure-JAX reference (module semantics) for validation.
# ----------------------------------------------------------------------------
def reference_forward(pooled, params):
    h = jnp.einsum("rpqc,cd->rpqd", pooled, params["res5_w"]) + params["res5_b"][0]
    h = jnp.maximum(h, 0.0)
    feats = h.mean(axis=(1, 2))
    feats = feats / jnp.linalg.norm(feats, axis=1, keepdims=True)
    txt = params["text_features"]
    txt = txt / jnp.linalg.norm(txt, axis=1, keepdims=True)
    logits = jnp.exp(params["logit_scale"]) * feats @ txt.T
    return jax.nn.softmax(logits, axis=-1)


if __name__ == "__main__":
    B, C, H, W = 2, 4, 16, 16       # backbone feature map (NCHW)
    STRIDE = 4                      # feature stride -> image is 64x64
    P = 8                           # pooler_resolution
    D = 32                          # res5 output channels / CLIP embed dim
    K = 16                          # number of text classes
    R_PER_IMG = 8                   # 16 ROIs total -> grid of 2 ROI tiles

    key = jax.random.PRNGKey(0)
    k1, k2, k3, k4, k5 = jax.random.split(key, 5)

    features = jax.random.normal(k1, (B, C, H, W), jnp.float32)

    img_size = float(H * STRIDE)
    xy1 = jax.random.uniform(k2, (B * R_PER_IMG, 2),
                             minval=0.0, maxval=0.5 * img_size)
    wh = jax.random.uniform(k3, (B * R_PER_IMG, 2),
                            minval=0.2 * img_size, maxval=0.45 * img_size)
    proposal_boxes = jnp.concatenate([xy1, xy1 + wh], axis=1)   # (R, 4) xyxy
    batch_idx = jnp.repeat(jnp.arange(B), R_PER_IMG)            # (R,)

    params = {
        "res5_w": 0.1 * jax.random.normal(k4, (C, D), jnp.float32),
        "res5_b": jnp.zeros((1, D), jnp.float32),
        "text_features": jax.random.normal(k5, (K, D), jnp.float32),
        "logit_scale": jnp.array(jnp.log(1.0 / 0.07), jnp.float32),
    }

    probs = clip_res5_roi_heads_forward(features, proposal_boxes, batch_idx,
                                        params, P, STRIDE)
    probs = jax.block_until_ready(probs)

    assert probs.shape == (B * R_PER_IMG, K)
    assert bool(jnp.all(jnp.isfinite(probs)))
    # softmax rows sum to ~1 (approx reciprocal + bf16 matmuls)
    assert bool(jnp.all(jnp.abs(jnp.sum(probs, axis=-1) - 1.0) < 1e-2))

    # loose check against the pure-JAX f32 reference (bf16 MXU operands)
    pooled = roi_align(features, proposal_boxes, batch_idx, P, 1.0 / STRIDE)
    ref = reference_forward(pooled, params)
    assert bool(jnp.max(jnp.abs(probs - ref)) < 0.1)

    print("KERNEL_OK")
</pallas_src>

<mosaic_0001>
module attributes {stable_mosaic.version = 11 : i64} {
  func.func @kernel(%arg0: i32, %arg1: memref<512x128xbf16, #tpu.memory_space<vmem>>, %arg2: memref<128x128xbf16, #tpu.memory_space<vmem>>, %arg3: memref<1x128xf32, #tpu.memory_space<vmem>>, %arg4: memref<128x128xbf16, #tpu.memory_space<vmem>>, %arg5: memref<8x128xf32, #tpu.memory_space<vmem>>) attributes {dimension_semantics = [#tpu.dimension_semantics<parallel>], iteration_bounds = array<i64: 2>, scalar_prefetch = 0 : i64, scratch_operands = 0 : i64, tpu.core_type = #tpu.core_type<tc>, window_params = [{transform_indices = @transform_0, window_bounds = array<i64: 512, 128>}, {pipeline_mode = #tpu.pipeline_mode<synchronous>, transform_indices = @transform_1, window_bounds = array<i64: 128, 128>}, {pipeline_mode = #tpu.pipeline_mode<synchronous>, transform_indices = @transform_2, window_bounds = array<i64: 1, 128>}, {pipeline_mode = #tpu.pipeline_mode<synchronous>, transform_indices = @transform_3, window_bounds = array<i64: 128, 128>}, {transform_indices = @transform_4, window_bounds = array<i64: 8, 128>}]} {
    %c0 = arith.constant 0 : index
    %c0_0 = arith.constant 0 : index
    %0 = vector.load %arg1[%c0, %c0_0] : memref<512x128xbf16, #tpu.memory_space<vmem>>, vector<512x128xbf16>
    %c0_1 = arith.constant 0 : index
    %c0_2 = arith.constant 0 : index
    %1 = vector.load %arg2[%c0_1, %c0_2] : memref<128x128xbf16, #tpu.memory_space<vmem>>, vector<128x128xbf16>
    %cst = arith.constant dense<0.000000e+00> : vector<512x128xf32>
    %2 = tpu.matmul %0, %1, %cst {dimension_numbers = #tpu.dot_dimension_numbers<[1], [0], [0], [1], [0, 0, 1, 1], [], []>} : vector<512x128xbf16>, vector<128x128xbf16>, vector<512x128xf32> -> vector<512x128xf32>
    %c0_3 = arith.constant 0 : index
    %c0_4 = arith.constant 0 : index
    %3 = vector.load %arg3[%c0_3, %c0_4] : memref<1x128xf32, #tpu.memory_space<vmem>>, vector<1x128xf32>
    %4 = vector.broadcast %3 : vector<1x128xf32> to vector<512x128xf32>
    %5 = arith.addf %2, %4 : vector<512x128xf32>
    %cst_5 = arith.constant 0.000000e+00 : f32
    %6 = vector.broadcast %cst_5 : f32 to vector<512x128xf32>
    %7 = arith.maximumf %5, %6 : vector<512x128xf32>
    %8 = vector.shape_cast %7 : vector<512x128xf32> to vector<8x64x128xf32>
    %cst_6 = arith.constant dense<0.000000e+00> : vector<8x128xf32>
    %9 = vector.multi_reduction <add>, %8, %cst_6 [1] : vector<8x64x128xf32> to vector<8x128xf32>
    %cst_7 = arith.constant 1.562500e-02 : f32
    %10 = vector.broadcast %cst_7 : f32 to vector<8x128xf32>
    %11 = arith.mulf %9, %10 : vector<8x128xf32>
    %12 = arith.mulf %11, %11 : vector<8x128xf32>
    %cst_8 = arith.constant dense<0.000000e+00> : vector<8xf32>
    %13 = vector.multi_reduction <add>, %12, %cst_8 [1] : vector<8x128xf32> to vector<8xf32>
    %14 = vector.shape_cast %13 : vector<8xf32> to vector<8x1xf32>
    %cst_9 = arith.constant 9.99999996E-13 : f32
    %15 = vector.broadcast %cst_9 : f32 to vector<8x1xf32>
    %16 = arith.addf %14, %15 : vector<8x1xf32>
    %17 = math.rsqrt %16 : vector<8x1xf32>
    %18 = vector.broadcast %17 : vector<8x1xf32> to vector<8x128xf32>
    %19 = arith.mulf %11, %18 : vector<8x128xf32>
    %20 = arith.truncf %19 : vector<8x128xf32> to vector<8x128xbf16>
    %c0_10 = arith.constant 0 : index
    %c0_11 = arith.constant 0 : index
    %21 = vector.load %arg4[%c0_10, %c0_11] : memref<128x128xbf16, #tpu.memory_space<vmem>>, vector<128x128xbf16>
    %cst_12 = arith.constant dense<0.000000e+00> : vector<8x128xf32>
    %22 = tpu.matmul %20, %21, %cst_12 {dimension_numbers = #tpu.dot_dimension_numbers<[1], [0], [0], [1], [0, 0, 1, 1], [], []>} : vector<8x128xbf16>, vector<128x128xbf16>, vector<8x128xf32> -> vector<8x128xf32>
    %23 = tpu.iota {dimensions = array<i32: 1>} : vector<8x128xi32>
    %c16_i32 = arith.constant 16 : i32
    %24 = vector.broadcast %c16_i32 : i32 to vector<8x128xi32>
    %25 = arith.cmpi slt, %23, %24 : vector<8x128xi32>
    %cst_13 = arith.constant -1.000000e+30 : f32
    %26 = vector.broadcast %cst_13 : f32 to vector<8x128xf32>
    %27 = arith.select %25, %22, %26 : vector<8x128xi1>, vector<8x128xf32>
    %cst_14 = arith.constant dense<0xFF800000> : vector<8xf32>
    %28 = vector.multi_reduction <maximumf>, %27, %cst_14 [1] : vector<8x128xf32> to vector<8xf32>
    %29 = vector.shape_cast %28 : vector<8xf32> to vector<8x1xf32>
    %30 = vector.broadcast %29 : vector<8x1xf32> to vector<8x128xf32>
    %31 = arith.subf %27, %30 : vector<8x128xf32>
    %32 = math.exp %31 : vector<8x128xf32>
    %cst_15 = arith.constant dense<0.000000e+00> : vector<8xf32>
    %33 = vector.multi_reduction <add>, %32, %cst_15 [1] : vector<8x128xf32> to vector<8xf32>
    %34 = vector.shape_cast %33 : vector<8xf32> to vector<8x1xf32>
    %35 = tpu.reciprocal %34 {approx = true} : vector<8x1xf32> -> vector<8x1xf32>
    %36 = vector.broadcast %35 : vector<8x1xf32> to vector<8x128xf32>
    %37 = arith.mulf %32, %36 : vector<8x128xf32>
    %c0_16 = arith.constant 0 : index
    %c0_17 = arith.constant 0 : index
    %38 = vector.load %arg5[%c0_16, %c0_17] : memref<8x128xf32, #tpu.memory_space<vmem>>, vector<8x128xf32>
    tpu.vector_store %arg5[%c0_16, %c0_17], %37 {strides = array<i32>} : memref<8x128xf32, #tpu.memory_space<vmem>>, vector<8x128xf32>,
    return
  }
  func.func @transform_0(%arg0: i32) -> (i32, i32) {
    %c0_i32 = arith.constant 0 : i32
    %c0_i32_0 = arith.constant 0 : i32
    return %arg0, %c0_i32 : i32, i32
  }
  func.func @transform_1(%arg0: i32) -> (i32, i32) {
    %c0_i32 = arith.constant 0 : i32
    %c0_i32_0 = arith.constant 0 : i32
    %c0_i32_1 = arith.constant 0 : i32
    return %c0_i32, %c0_i32_0 : i32, i32
  }
  func.func @transform_2(%arg0: i32) -> (i32, i32) {
    %c0_i32 = arith.constant 0 : i32
    %c0_i32_0 = arith.constant 0 : i32
    %c0_i32_1 = arith.constant 0 : i32
    return %c0_i32, %c0_i32_0 : i32, i32
  }
  func.func @transform_3(%arg0: i32) -> (i32, i32) {
    %c0_i32 = arith.constant 0 : i32
    %c0_i32_0 = arith.constant 0 : i32
    %c0_i32_1 = arith.constant 0 : i32
    return %c0_i32, %c0_i32_0 : i32, i32
  }
  func.func @transform_4(%arg0: i32) -> (i32, i32) {
    %c0_i32 = arith.constant 0 : i32
    %c0_i32_0 = arith.constant 0 : i32
    return %arg0, %c0_i32 : i32, i32
  }
}

</mosaic_0001>

<bundles_post_ra>
// kernel: tpu_custom_call.1
= control target key start
LH: loop header
LB: loop body
LE: loop exit
PB: predicated region body
PF: predicated region fallthrough
CT: control target
= control target key end

     0   :  { %9 = vsyncpa [#allocation3], 0  ;;  %s2308_s0 = inlined_call_operand.hbm [shape: bf16[1024,128], index: 0, kind: input, shape index: {}]   ;;  %s2309_s1 = inlined_call_operand.hbm [shape: bf16[128,128], index: 1, kind: input, shape index: {}]   ;;  %s2310_s2 = inlined_call_operand.vmem [shape: f32[1,128], index: 2, kind: input, shape index: {}]   ;;  %s2311_s3 = inlined_call_operand.hbm [shape: bf16[128,128], index: 3, kind: input, shape index: {}]   ;;  %s2312_s4 = inlined_call_operand.hbm [shape: f32[16,128], index: 4, kind: output, shape index: {}]  }
   0x1   :  { %11 = vsyncpa [#allocation3 + $0x1], 0 }
   0x2   :  { %12 = vsyncpa [#allocation6], 0 }
   0x3   :  { %13 = vsyncpa [#allocation4], 0 }
   0x4   :  { %15 = vsyncpa [#allocation4 + $0x1], 0  ;;  %s1907_s15 = smov 0   ;;  %s1909_s16 = smov 0  }
   0x5   :  { %s1911_s17 = smov 0   ;;  %s1913_s18 = smov 0  }
   0x6 LB: > { %s1928_s19 = sadd.s32 4294967295, %s1872_s18   ;;  %s1359_s20 = sadd.s32 4294967294, %s1872_s18   ;;  %s1872_s18 = sphi %s1913_s18, %s2332_s18   ;;  %s1868_s17 = sphi %s1911_s17, %s2331_s17   ;;  %s1864_s16 = sphi %s1909_s16, %s2330_s16   ;;  %s1860_s15 = sphi %s1907_s15, %s2329_s15  }
   0x7   : > { %p41_p0 = scmp.ne.s32.totalorder %s1864_s16, %s1860_s15  ;;  %p2313_p1 = scmp.eq.s32.totalorder %s1928_s19, 0 }
   0x8   : > { %p134_p3 = scmp.eq.s32.totalorder %s1359_s20, 1  ;;  %p1360_p5 = scmp.ge.s32.totalorder %s1872_s18, 1 }
   0x9   : > { %p1937_p4 = por %p2313_p1, %p41_p0  ;;  %p141_p7 = scmp.lt.s32.totalorder %s1872_s18, 3 }
   0xa   : > { %p1942_p6 = por %p134_p3, %p41_p0  ;;  %s1874_s24 = smov [#allocation5]  }
   0xb   : > { %s2316_s21 = scalar_select %p1937_p4, 1, 0 }
   0xc   : > { %s2317_s22 = scalar_select %p1942_p6, 1, 0 }
   0xd   : > { %p1947_p8 = pnand %p1360_p5, %p141_p7  ;;  %s153_s25 = sshll.u32 %s1874_s24, 4  ;;  %s1951_s25 = int_to_ptr.vmem [resolvable:$true] %s153_s25 }
   0xe   : > { %s1875_s27 = smov [#allocation7]   ;;  %s1716_s5 = scalar_lea.hbm %s2309_s1, 1024 }
   0xf   : > { %p1603_p9 = pneg %p1947_p8  ;;  %s169_s28 = sshll.u32 %s1875_s27, 4  ;;  %s1962_s28 = int_to_ptr.vmem [resolvable:$true] %s169_s28 }
  0x10   : > { %p1717_p12 = scmp.ne.s32.totalorder %s2309_s1, %s1716_s5  ;;  %p1723_p5 = scmp.lt.u32.totalorder %s1716_s5, %s2309_s1 }
  0x11   : > { %p1958_p11 = pnand %p1603_p9, %p2313_p1 }
  0x13   : > { %p1718_p13 = pneg %p1958_p11 }
  0x15   : > { %p1719_p0 = pnand %p1718_p13, %p1717_p12 }
  0x17   : > { %p1720_p3 = pneg %p1719_p0 }
  0x19   : > { %p1725_p7 = pnand %p1723_p5, %p1720_p3 }
  0x1b   : > { %1728 = shalt.err (!%p1725_p7)
}
  0x1c   : > { %s1729_s10 = scalar_lea.vmem %s1951_s25, 1024  ;;  %p1737_p2 = scmp.lt.s32.totalorder %s1951_s25, %s1951_s25 }
  0x1d   : > { %p1730_p9 = scmp.ne.s32.totalorder %s1951_s25, %s1729_s10  ;;  %p1738_p12 = scmp.lt.s32.totalorder %s1729_s10, %s1729_s10 }
  0x1f   : > { %p1732_p10 = pnand %p1730_p9, %p1718_p13  ;;  %p1739_p0 = por %p1738_p12, %p1737_p2 }
  0x21   : > { %p1733_p1 = pneg %p1732_p10 }
  0x23   : > { %p1740_p6 = pnand %p1739_p0, %p1733_p1 }
  0x25   : > { %1743 = shalt.err (!%p1740_p6)
}
  0x26   : > { %s1876_s11 = smov 64   ;;  %s1877_s12 = smov 4  }
  0x27   : > { %1606 = dma.hbm_to_vmem [thread:$0]  (!%p1958_p11), %s2309_s1, 1024, %s1951_s25, [#allocation6], %s1876_s11, %s1876_s11, %s1877_s12  }
  0x28   : > { %s1744_s27 = scalar_lea.hbm %s2311_s3, 1024 }
  0x29   : > { %p1745_p1 = scmp.ne.s32.totalorder %s2311_s3, %s1744_s27  ;;  %p1751_p10 = scmp.lt.u32.totalorder %s1744_s27, %s2311_s3 }
  0x2b   : > { %p1747_p2 = pnand %p1745_p1, %p1718_p13 }
  0x2d   : > { %p1748_p6 = pneg %p1747_p2 }
  0x2f   : > { %p1753_p3 = pnand %p1751_p10, %p1748_p6 }
  0x31   : > { %1756 = shalt.err (!%p1753_p3)
}
  0x32   : > { %s1757_s25 = scalar_lea.vmem %s1962_s28, 1024  ;;  %p1765_p12 = scmp.lt.s32.totalorder %s1962_s28, %s1962_s28 }
  0x33   : > { %p1758_p5 = scmp.ne.s32.totalorder %s1962_s28, %s1757_s25  ;;  %p1766_p0 = scmp.lt.s32.totalorder %s1757_s25, %s1757_s25 }
  0x35   : > { %p1760_p7 = pnand %p1758_p5, %p1718_p13  ;;  %p1767_p1 = por %p1766_p0, %p1765_p12 }
  0x37   : > { %p1761_p9 = pneg %p1760_p7 }
  0x39   : > { %p1768_p2 = pnand %p1767_p1, %p1761_p9 }
  0x3b   : > { %1771 = shalt.err (!%p1768_p2)
}
  0x3c   : > { %1609 = dma.hbm_to_vmem [thread:$0]  (!%p1958_p11), %s2311_s3, 1024, %s1962_s28, [#allocation6], %s1876_s11, %s1876_s11, %s1877_s12  }
  0x3d   : > { %s2023_s26 = sadd.s32 1, %s1872_s18   ;;  %s28_s9 = sadd.s32 1, %s1868_s17 }
  0x3e   : > { %s25_s10 = ssub.s32 %s1872_s18, %s2023_s26  ;;  %p35_p13 = scmp.ne.s32.totalorder %s1868_s17, %s1864_s16 }
  0x3f   : > { %p26_p6 = scmp.eq.s32.totalorder %s25_s10, 0  ;;  %p36_p10 = scmp.eq.s32.totalorder %s1872_s18, 0 }
  0x40   : > { %p2320_p3 = scmp.eq.s32.totalorder %s1928_s19, 1  ;;  %p1620_p7 = scmp.lt.s32.totalorder %s1872_s18, 2 }
  0x41   : > { %s2039_s14 = scalar_select %p26_p6, %s1868_s17, %s28_s9  }
  0x42   : > { %p2033_p5 = por %p2320_p3, %p35_p13  ;;  %p37_p9 = por %p36_p10, %p35_p13 }
  0x43   : > { %s183_s20 = sand.u32 1, %s1868_s17   ;;  %s1425_s28 = sshll.u32 %s1872_s18, 12 }
  0x44   : > { %s2321_s13 = scalar_select %p2033_p5, 1, 0 }
  0x45   : > { %s1364_s24 = sshll.u32 %s183_s20, 8  ;;  %s2046_s30 = scalar_lea.hbm %s2308_s0, %s1425_s28 }
  0x46   : > { %s187_s5 = scalar_lea.vmem [#allocation2], %s1364_s24  ;;  %p2050_p11 = pnand %p1620_p7, %p37_p9 }
  0x47   : > { %s194_s6 = sshll.u32 %s187_s5, 4  ;;  %s2054_s7 = scalar_lea.sflag [#allocation3], %s183_s20  ;;  %s2048_s6 = int_to_ptr.vmem [resolvable:$true] %s194_s6 }
  0x48   : > { %s1772_s8 = scalar_lea.hbm %s2046_s30, 4096  ;;  %p1774_p0 = pneg %p2050_p11 }
  0x49   : > { %p1773_p12 = scmp.ne.s32.totalorder %s2046_s30, %s1772_s8  ;;  %s1777_s24 = scalar_lea.hbm %s2308_s0, 8192 }
  0x4a   : > { %p1778_p13 = scmp.lt.u32.totalorder %s2046_s30, %s2308_s0  ;;  %p1779_p6 = scmp.lt.u32.totalorder %s1777_s24, %s1772_s8 }
  0x4b   : > { %p1775_p1 = pnand %p1774_p0, %p1773_p12  ;;  %p1781_p3 = scmp.lt.u32.totalorder %s1772_s8, %s2046_s30 }
  0x4c   : > { %p1780_p10 = por %p1779_p6, %p1778_p13 }
  0x4d   : > { %p1776_p2 = pneg %p1775_p1 }
  0x4e   : > { %p1782_p7 = por %p1781_p3, %p1780_p10 }
  0x50   : > { %p1783_p9 = pnand %p1782_p7, %p1776_p2 }
  0x52   : > { %1786 = shalt.err (!%p1783_p9)
}
  0x53   : > { %s1787_s20 = scalar_lea.vmem %s2048_s6, 4096  ;;  %s1878_s29 = smov [#allocation2]  }
  0x54   : > { %p1788_p12 = scmp.ne.s32.totalorder %s2048_s6, %s1787_s20  ;;  %s1792_s5 = sshll.u32 %s1878_s29, 4  ;;  %s1793_s5 = int_to_ptr.vmem [resolvable:$false] %s1792_s5 }
  0x55   : > { %s1794_s9 = scalar_lea.vmem %s1793_s5, 8192  ;;  %p1795_p4 = scmp.lt.s32.totalorder %s2048_s6, %s1793_s5 }
  0x56   : > { %p1790_p1 = pnand %p1788_p12, %p1774_p0  ;;  %p1796_p13 = scmp.lt.s32.totalorder %s1794_s9, %s1787_s20 }
  0x58   : > { %p1791_p5 = pneg %p1790_p1  ;;  %p1797_p6 = por %p1796_p13, %p1795_p4 }
  0x5a   : > { %p1798_p10 = pnand %p1797_p6, %p1791_p5 }
  0x5c   : > { %1801 = shalt.err (!%p1798_p10)
}
  0x5d   : > { %1613 = dma.hbm_to_vmem [thread:$0]  (!%p2050_p11), %s2046_s30, 4096, %s2048_s6, %s2054_s7, %s1876_s11, %s1876_s11, %s1877_s12  }
  0x5e   : > { %206 = sbr.rel (%p1947_p8) target bundleno = 1168 (0x490), region = 36  ;;  %s2088_s8 = sand.u32 (!%p1947_p8), 1, %s1864_s16  }
  0x5f   : > { %s1368_s10 = sshll.u32 (!%p1947_p8), %s2088_s8, 8  ;;  %s209_s24 = scalar_lea.sflag (!%p1947_p8), [#allocation3], %s2088_s8 }
  0x60   : > { %s2092_s28 = scalar_lea.vmem (!%p1947_p8), [#allocation2], %s1368_s10  ;;  %p2323_p4 = scmp.ne.s32.totalorder (!%p1947_p8), %s2316_s21, 0 }
  0x65   : > { %1847 = dma.done.wait (%p2323_p4), %s209_s24, 4096  }
  0x66   : > { %1849 = vsyncadd (%p2323_p4), %s209_s24, 4294963200  ;;  %p2324_p5 = scmp.eq.s32.totalorder %s1928_s19, 0 }
  0x68   : > { %1851 = dma.done.wait (%p2324_p5), [#allocation6], 2048   ;;  %p2325_p8 = pmov %p2324_p5 }
  0x69   : > { %v1662_v0 = vld [vmem:[#allocation5] sm:$0xff]   ;;  %v1663_v1 = vld [vmem:[#allocation5 + $0x8] sm:$0xff]   ;;  %v1664_v2 = vld [vmem:[#allocation5 + $0x10] sm:$0xff]   ;;  %v1879_v41 = vmov 0.0   ;;  %vm1055_vm0 = vcmask 1041409   ;;  %vm1057_vm1 = vcmask 1042434  }
  0x6a   : > { %1853 = vsyncadd (%p2325_p8), [#allocation6], 4294965248  ;;  %1475 = vmatprep.subr.bf16.mxu0 %v1662_v0  ;;  %1575 = vmatprep.subr.bf16.mxu1 %v1662_v0  ;;  %v1665_v3 = vld [vmem:[#allocation5 + $0x18] sm:$0xff]   ;;  %v1670_v4 = vld [vmem:[%s2092_s28] sm:$0xff]   ;;  %vm1059_vm2 = vcmask 1043459   ;;  %vm1061_vm3 = vcmask 1044484  }
  0x6b   : > { %1476 = vmatpush3.bf16.msra.mxu0 %v1662_v0  ;;  %1583 = vmatpush3.bf16.msra.mxu1 %v1662_v0  ;;  %v1666_v5 = vld [vmem:[#allocation5 + $0x20] sm:$0xff]   ;;  %v1674_v6 = vld [vmem:[%s2092_s28 + $0x90] sm:$0xff]   ;;  %v1667_v7 = vld [vmem:[#allocation5 + $0x28] sm:$0xff]   ;;  %vm1063_vm4 = vcmask 1045509   ;;  %vm1065_vm5 = vcmask 1046534   ;;  %vm1067_vm6 = vcmask 1047559  }
  0x6c   : > { %1477 = vmatprep.subr.bf16.mxu0 %v1663_v1  ;;  %1576 = vmatprep.subr.bf16.mxu1 %v1663_v1  ;;  %v1668_v8 = vld [vmem:[#allocation5 + $0x30] sm:$0xff]   ;;  %v1669_v9 = vld [vmem:[#allocation5 + $0x38] sm:$0xff]   ;;  %v1671_v10 = vld [vmem:[%s2092_s28 + $0x8] sm:$0xff]   ;;  %vm1880_vm7 = vmmov 0   ;;  %s1371_s11 = sshll.u32 %s2088_s8, 3  ;;  %s1422_s12 = sshll.u32 %s1928_s19, 7 }
  0x6d   : > { %1491 = vmatprep.mubr.bf16.mxu0 %v1670_v4  ;;  %1527 = vmatprep.mubr.bf16.mxu1 %v1674_v6  ;;  %v1672_v11 = vld [vmem:[%s2092_s28 + $0x10] sm:$0xff]   ;;  %v1675_v12 = vld [vmem:[%s2092_s28 + $0x98] sm:$0xff]   ;;  %v1678_v13 = vld [vmem:[%s2092_s28 + $0xa0] sm:$0xff]   ;;  %s244_s30 = scalar_lea.vmem [#allocation8], %s1371_s11  ;;  %s2264_s27 = scalar_lea.hbm %s2312_s4, %s1422_s12 }
  0x6e   : > { %v1673_v14 = vld [vmem:[%s2092_s28 + $0x18] sm:$0xff]   ;;  %v1676_v15 = vld [vmem:[%s2092_s28 + $0x20] sm:$0xff]   ;;  %v1679_v16 = vld [vmem:[%s2092_s28 + $0xa8] sm:$0xff]   ;;  %s1270_s6 = sshll.u32 %s244_s30, 4  ;;  %s1257_s20 = scalar_lea.sflag [#allocation4], %s2088_s8  ;;  %s2266_s6 = int_to_ptr.vmem [resolvable:$true] %s1270_s6 }
  0x6f   : > { %1478 = vmatpush3.bf16.msra.mxu0 %v1663_v1  ;;  %1584 = vmatpush3.bf16.msra.mxu1 %v1663_v1  ;;  %v1682_v17 = vld [vmem:[%s2092_s28 + $0xb0] sm:$0xff]   ;;  %v1677_v18 = vld [vmem:[%s2092_s28 + $0x28] sm:$0xff]   ;;  %v1683_v19 = vld [vmem:[%s2092_s28 + $0xb8] sm:$0xff]   ;;  %s1802_s29 = scalar_lea.vmem %s2266_s6, 128  ;;  %p2326_p0 = scmp.ne.s32.totalorder %s2321_s13, 0 }
  0x70   : > { %1479 = vmatprep.subr.bf16.mxu0 %v1664_v2  ;;  %1577 = vmatprep.subr.bf16.mxu1 %v1664_v2  ;;  %v1680_v20 = vld [vmem:[%s2092_s28 + $0x30] sm:$0xff]   ;;  %v1686_v21 = vld [vmem:[%s2092_s28 + $0xc0] sm:$0xff]   ;;  %v1681_v22 = vld [vmem:[%s2092_s28 + $0x38] sm:$0xff]   ;;  %p1803_p11 = scmp.ne.s32.totalorder %s2266_s6, %s1802_s29  ;;  %s1881_s19 = smov [#allocation8]  }
  0x71   : > { %v1687_v23 = vld [vmem:[%s2092_s28 + $0xc8] sm:$0xff]   ;;  %v1684_v24 = vld [vmem:[%s2092_s28 + $0x40] sm:$0xff]   ;;  %v1690_v25 = vld [vmem:[%s2092_s28 + $0xd0] sm:$0xff]   ;;  %s1806_s5 = sshll.u32 %s1881_s19, 4  ;;  %s1807_s5 = int_to_ptr.vmem [resolvable:$false] %s1806_s5 }
  0x72   : > { %v1685_v26 = vld [vmem:[%s2092_s28 + $0x48] sm:$0xff]   ;;  %v1691_v27 = vld [vmem:[%s2092_s28 + $0xd8] sm:$0xff]   ;;  %v1688_v28 = vld [vmem:[%s2092_s28 + $0x50] sm:$0xff]   ;;  %p1804_p2 = pnand %p1803_p11, %p2326_p0  ;;  %s1808_s9 = scalar_lea.vmem %s1807_s5, 256 }
  0x73   : > { %1480 = vmatpush3.bf16.msra.mxu0 %v1664_v2  ;;  %1585 = vmatpush3.bf16.msra.mxu1 %v1664_v2  ;;  %v1694_v29 = vld [vmem:[%s2092_s28 + $0xe0] sm:$0xff]   ;;  %v1689_v30 = vld [vmem:[%s2092_s28 + $0x58] sm:$0xff]   ;;  %v1695_v31 = vld [vmem:[%s2092_s28 + $0xe8] sm:$0xff]   ;;  %p1809_p7 = scmp.lt.s32.totalorder %s2266_s6, %s1807_s5  ;;  %p1810_p9 = scmp.lt.s32.totalorder %s1808_s9, %s1802_s29 }
  0x74   : > { %1481 = vmatprep.subr.bf16.mxu0 %v1665_v3  ;;  %1578 = vmatprep.subr.bf16.mxu1 %v1665_v3  ;;  %v1692_v32 = vld [vmem:[%s2092_s28 + $0x60] sm:$0xff]   ;;  %v1698_v33 = vld [vmem:[%s2092_s28 + $0xf0] sm:$0xff]   ;;  %v1693_v34 = vld [vmem:[%s2092_s28 + $0x68] sm:$0xff]   ;;  %p1805_p3 = pneg %p1804_p2 }
  0x75   : > { %v1699_v35 = vld [vmem:[%s2092_s28 + $0xf8] sm:$0xff]   ;;  %v1696_v36 = vld [vmem:[%s2092_s28 + $0x70] sm:$0xff]   ;;  %v1700_v38 = vld [vmem:[%s2092_s28 + $0x80] sm:$0xff]   ;;  %p1811_p12 = por %p1810_p9, %p1809_p7 }
  0x76   : > { %v1697_v37 = vld [vmem:[%s2092_s28 + $0x78] sm:$0xff]   ;;  %v1701_v39 = vld [vmem:[%s2092_s28 + $0x88] sm:$0xff]   ;;  %v1702_v40 = vld [vmem:[#allocation7] sm:$0xff]  }
  0x77   : > { %1482 = vmatpush3.bf16.msra.mxu0 %v1665_v3  ;;  %1586 = vmatpush3.bf16.msra.mxu1 %v1665_v3  ;;  %v1703_v42 = vld [vmem:[#allocation7 + $0x8] sm:$0xff]   ;;  %v1704_v43 = vld [vmem:[#allocation7 + $0x10] sm:$0xff]   ;;  %v1705_v44 = vld [vmem:[#allocation7 + $0x18] sm:$0xff]   ;;  %p1812_p1 = pnand %p1811_p12, %p1805_p3 }
  0x78   : > { %1483 = vmatprep.subr.bf16.mxu0 %v1666_v5  ;;  %1579 = vmatprep.subr.bf16.mxu1 %v1666_v5  ;;  %v2142_v45 = vld [vmem:[%s2310_s2] ss:$0 sm:$0xff] }
  0x7b   : > { %1484 = vmatpush3.bf16.msra.mxu0 %v1666_v5  ;;  %1587 = vmatpush3.bf16.msra.mxu1 %v1666_v5 }
  0x7c   : > { %1485 = vmatprep.subr.bf16.mxu0 %v1667_v7  ;;  %1580 = vmatprep.subr.bf16.mxu1 %v1667_v7 }
  0x7f   : > { %1486 = vmatpush3.bf16.msra.mxu0 %v1667_v7  ;;  %1588 = vmatpush3.bf16.msra.mxu1 %v1667_v7 }
  0x80   : > { %1487 = vmatprep.subr.bf16.mxu0 %v1668_v8  ;;  %1581 = vmatprep.subr.bf16.mxu1 %v1668_v8 }
  0x83   : > { %1488 = vmatpush3.bf16.msra.mxu0 %v1668_v8  ;;  %1589 = vmatpush3.bf16.msra.mxu1 %v1668_v8 }
  0x84   : > { %1489 = vmatprep.subr.bf16.mxu0 %v1669_v9  ;;  %1582 = vmatprep.subr.bf16.mxu1 %v1669_v9 }
  0x87   : > { %1490 = vmatpush3.bf16.msra.mxu0 %v1669_v9  ;;  %1590 = vmatpush3.bf16.msra.mxu1 %v1669_v9 }
  0x88   : > { %1555 = vmatprep.subr.bf16.mxu1 %v1879_v41 }
  0x8a   : > { %1492 = vmatmul.mubr.bf16.vlgmr.msra.gmra.mrb[0].mxu0 %v1671_v10  ;;  %1528 = vmatmul.mubr.bf16.vlgmr.msra.gmra.mrb[0].mxu1 %v1675_v12 }
  0x8b   : > { %1495 = vmatprep.mubr.bf16.mxu0 %v1672_v11  ;;  %1531 = vmatprep.mubr.bf16.mxu1 %v1678_v13 }
  0x8c   : > { %1556 = vmatpush3.bf16.msra.mxu1 %v1702_v40 }
  0x8d   : > { %1557 = vmatprep.subr.bf16.mxu1 %v1879_v41 }
  0x90   : > { %1558 = vmatpush3.bf16.msra.mxu1 %v1703_v42 }
  0x91   : > { %1559 = vmatprep.subr.bf16.mxu1 %v1879_v41 }
  0x92   : > { %1496 = vmatmul.mubr.bf16.gmra.mrb[4].mxu0 %v1673_v14  ;;  %1532 = vmatmul.mubr.bf16.gmra.mrb[4].mxu1 %v1679_v16 }
  0x93   : > { %1499 = vmatprep.mubr.bf16.mxu0 %v1676_v15  ;;  %1535 = vmatprep.mubr.bf16.mxu1 %v1682_v17 }
  0x94   : > { %1560 = vmatpush3.bf16.msra.mxu1 %v1704_v43 }
  0x95   : > { %1561 = vmatprep.subr.bf16.mxu1 %v1879_v41 }
  0x98   : > { %1562 = vmatpush3.bf16.msra.mxu1 %v1705_v44 }
  0x99   : > { %1563 = vmatprep.subr.bf16.mxu1 %v1879_v41 }
  0x9a   : > { %1500 = vmatmul.mubr.bf16.gmra.mrb[8].mxu0 %v1677_v18  ;;  %1536 = vmatmul.mubr.bf16.gmra.mrb[8].mxu1 %v1683_v19 }
  0x9b   : > { %1503 = vmatprep.mubr.bf16.mxu0 %v1680_v20  ;;  %1539 = vmatprep.mubr.bf16.mxu1 %v1686_v21 }
  0xa2   : > { %1504 = vmatmul.mubr.bf16.gmra.mrb[12].mxu0 %v1681_v22  ;;  %1540 = vmatmul.mubr.bf16.gmra.mrb[12].mxu1 %v1687_v23 }
  0xa3   : > { %1507 = vmatprep.mubr.bf16.mxu0 %v1684_v24  ;;  %1543 = vmatprep.mubr.bf16.mxu1 %v1690_v25 }
  0xaa   : > { %1508 = vmatmul.mubr.bf16.gmra.mrb[16].mxu0 %v1685_v26  ;;  %1544 = vmatmul.mubr.bf16.gmra.mrb[16].mxu1 %v1691_v27 }
  0xab   : > { %1511 = vmatprep.mubr.bf16.mxu0 %v1688_v28  ;;  %1547 = vmatprep.mubr.bf16.mxu1 %v1694_v29 }
  0xb2   : > { %1512 = vmatmul.mubr.bf16.gmra.mrb[20].mxu0 %v1689_v30  ;;  %1548 = vmatmul.mubr.bf16.gmra.mrb[20].mxu1 %v1695_v31 }
  0xb3   : > { %1515 = vmatprep.mubr.bf16.mxu0 %v1692_v32  ;;  %1551 = vmatprep.mubr.bf16.mxu1 %v1698_v33 }
  0xba   : > { %1516 = vmatmul.mubr.bf16.gmra.mrb[24].mxu0 %v1693_v34  ;;  %1552 = vmatmul.mubr.bf16.gmra.mrb[24].mxu1 %v1699_v35 }
  0xbb   : > { %1519 = vmatprep.mubr.bf16.mxu0 %v1696_v36  ;;  %1571 = vmatprep.mubr.msk.bf16.mxu1 %vm1880_vm7, %v1879_v41 }
  0xc2   : > { %1520 = vmatmul.mubr.bf16.gmra.mrb[28].mxu0 %v1697_v37 }
  0xc3   : > { %1523 = vmatprep.mubr.bf16.mxu0 %v1700_v38 }
  0xca   : > { %1524 = vmatmul.mubr.bf16.gmra.mrb[32].mxu0 %v1701_v39 }
 0x15d   : > { %v1493_v46 = vpop.f32.mrb[0].mxu0  ;;  %v2144_v47 = vpop.f32.mrb[0].mxu1 }
 0x15e   : > { %v608_v48 = vpop.f32.mrb[1].mxu0  ;;  %v2146_v49 = vpop.f32.mrb[1].mxu1  ;;  %v617_v55 = vadd.f32 %v1493_v46, %v2142_v45 }
 0x15f   : > { %v609_v50 = vadd.f32 %v2142_v45, %v608_v48  ;;  %v1494_v51 = vpop.f32.mrb[2].mxu0  ;;  %v2149_v52 = vpop.f32.mrb[2].mxu1 }
 0x160   : > { %v611_v53 = vpop.f32.mrb[3].mxu0  ;;  %v2151_v54 = vpop.f32.mrb[3].mxu1  ;;  %v620_v58 = vadd.f32 %v1494_v51, %v2142_v45  ;;  %v865_v60 = vmax.f32 %v617_v55, 0.0 }
 0x161   : > { %v612_v56 = vadd.f32 %v2142_v45, %v611_v53  ;;  %v863_v57 = vmax.f32 %v609_v50, 0.0 }
 0x162   : > { %v866_v2 = vmax.f32 %v620_v58, 0.0 }
 0x163   : > { %v864_v59 = vmax.f32 %v612_v56, 0.0 }
 0x165   : > { %v927_v61 = vadd.f32 %v864_v59, %v863_v57  ;;  %v1497_v62 = vpop.f32.mrb[4].mxu0  ;;  %v1533_v63 = vpop.f32.mrb[4].mxu1 }
 0x166   : > { %v624_v0 = vpop.f32.mrb[5].mxu0  ;;  %v768_v1 = vpop.f32.mrb[5].mxu1  ;;  %v777_v9 = vadd.f32 %v1533_v63, %v2142_v45  ;;  %v633_v11 = vadd.f32 %v1497_v62, %v2142_v45 }
 0x167   : > { %v928_v3 = vadd.f32 %v927_v61, %v865_v60  ;;  %v625_v4 = vadd.f32 %v2142_v45, %v624_v0  ;;  %v1498_v5 = vpop.f32.mrb[6].mxu0  ;;  %v769_v6 = vadd.f32 %v2142_v45, %v768_v1  ;;  %v1534_v7 = vpop.f32.mrb[6].mxu1 }
 0x168   : > { %v627_v8 = vpop.f32.mrb[7].mxu0  ;;  %v771_v10 = vpop.f32.mrb[7].mxu1  ;;  %v780_v16 = vadd.f32 %v1534_v7, %v2142_v45  ;;  %v636_v19 = vadd.f32 %v1498_v5, %v2142_v45  ;;  %v905_v21 = vmax.f32 %v777_v9, 0.0  ;;  %v869_v23 = vmax.f32 %v633_v11, 0.0 }
 0x169   : > { %v867_v12 = vmax.f32 %v625_v4, 0.0  ;;  %v929_v13 = vadd.f32 %v928_v3, %v866_v2  ;;  %v628_v14 = vadd.f32 %v2142_v45, %v627_v8  ;;  %v903_v15 = vmax.f32 %v769_v6, 0.0 }
 0x16a   : > { %v772_v17 = vadd.f32 %v2142_v45, %v771_v10  ;;  %v906_v28 = vmax.f32 %v780_v16, 0.0  ;;  %v870_v31 = vmax.f32 %v636_v19, 0.0 }
 0x16b   : > { %v930_v18 = vadd.f32 %v929_v13, %v867_v12  ;;  %v868_v20 = vmax.f32 %v628_v14, 0.0 }
 0x16c   : > { %v904_v22 = vmax.f32 %v772_v17, 0.0 }
 0x16d   : > { %v931_v24 = vadd.f32 %v930_v18, %v868_v20  ;;  %v1501_v25 = vpop.f32.mrb[8].mxu0  ;;  %v1537_v26 = vpop.f32.mrb[8].mxu1 }
 0x16e   : > { %v640_v27 = vpop.f32.mrb[9].mxu0  ;;  %v992_v29 = vadd.f32 %v904_v22, %v903_v15  ;;  %v784_v30 = vpop.f32.mrb[9].mxu1  ;;  %v793_v39 = vadd.f32 %v1537_v26, %v2142_v45  ;;  %v649_v43 = vadd.f32 %v1501_v25, %v2142_v45 }
 0x16f   : > { %v932_v32 = vadd.f32 %v931_v24, %v869_v23  ;;  %v641_v33 = vadd.f32 %v2142_v45, %v640_v27  ;;  %v1502_v34 = vpop.f32.mrb[10].mxu0  ;;  %v785_v35 = vadd.f32 %v2142_v45, %v784_v30  ;;  %v1538_v36 = vpop.f32.mrb[10].mxu1 }
 0x170   : > { %v643_v37 = vpop.f32.mrb[11].mxu0  ;;  %v993_v38 = vadd.f32 %v992_v29, %v905_v21  ;;  %v787_v40 = vpop.f32.mrb[11].mxu1  ;;  %v796_v50 = vadd.f32 %v1538_v36, %v2142_v45  ;;  %v652_v55 = vadd.f32 %v1502_v34, %v2142_v45  ;;  %v909_v57 = vmax.f32 %v793_v39, 0.0 }
 0x171   : > { %v2167_v42 = vadd.f32 %v932_v32, %v870_v31  ;;  %v644_v44 = vadd.f32 %v2142_v45, %v643_v37  ;;  %v907_v46 = vmax.f32 %v785_v35, 0.0  ;;  %v788_v51 = vadd.f32 %v2142_v45, %v787_v40 }
 0x172   : > { %v994_v48 = vadd.f32 %v993_v38, %v906_v28  ;;  %v871_v53 = vmax.f32 %v641_v33, 0.0  ;;  %v873_v60 = vmax.f32 %v649_v43, 0.0  ;;  %v910_v1 = vmax.f32 %v796_v50, 0.0 }
 0x173   : > { %v872_v56 = vmax.f32 %v644_v44, 0.0  ;;  %v908_v59 = vmax.f32 %v788_v51, 0.0  ;;  %v874_v4 = vmax.f32 %v652_v55, 0.0 }
 0x174   : > { %v995_v58 = vadd.f32 %v994_v48, %v907_v46 }
 0x175   : > { %v940_v61 = vadd.f32 %v872_v56, %v871_v53  ;;  %v1505_v62 = vpop.f32.mrb[12].mxu0  ;;  %v1541_v63 = vpop.f32.mrb[12].mxu1 }
 0x176   : > { %v656_v0 = vpop.f32.mrb[13].mxu0  ;;  %v996_v2 = vadd.f32 %v995_v58, %v908_v59  ;;  %v800_v3 = vpop.f32.mrb[13].mxu1  ;;  %v665_v13 = vadd.f32 %v1505_v62, %v2142_v45  ;;  %v809_v19 = vadd.f32 %v1541_v63, %v2142_v45 }
 0x177   : > { %v941_v5 = vadd.f32 %v940_v61, %v873_v60  ;;  %v657_v6 = vadd.f32 %v2142_v45, %v656_v0  ;;  %v1506_v7 = vpop.f32.mrb[14].mxu0  ;;  %v801_v8 = vadd.f32 %v2142_v45, %v800_v3  ;;  %v1542_v9 = vpop.f32.mrb[14].mxu1 }
 0x178   : > { %v659_v10 = vpop.f32.mrb[15].mxu0  ;;  %v997_v11 = vadd.f32 %v996_v2, %v909_v57  ;;  %v803_v12 = vpop.f32.mrb[15].mxu1  ;;  %v668_v17 = vadd.f32 %v1506_v7, %v2142_v45  ;;  %v812_v24 = vadd.f32 %v1542_v9, %v2142_v45  ;;  %v877_v25 = vmax.f32 %v665_v13, 0.0 }
 0x179   : > { %v875_v14 = vmax.f32 %v657_v6, 0.0  ;;  %v942_v15 = vadd.f32 %v941_v5, %v874_v4  ;;  %v660_v16 = vadd.f32 %v2142_v45, %v659_v10  ;;  %v911_v22 = vmax.f32 %v801_v8, 0.0 }
 0x17a   : > { %v2179_v18 = vadd.f32 %v997_v11, %v910_v1  ;;  %v804_v23 = vadd.f32 %v2142_v45, %v803_v12  ;;  %v913_v31 = vmax.f32 %v809_v19, 0.0  ;;  %v878_v33 = vmax.f32 %v668_v17, 0.0 }
 0x17b   : > { %v943_v20 = vadd.f32 %v942_v15, %v875_v14  ;;  %v876_v21 = vmax.f32 %v660_v16, 0.0  ;;  %v914_v40 = vmax.f32 %v812_v24, 0.0 }
 0x17c   : > { %v912_v28 = vmax.f32 %v804_v23, 0.0 }
 0x17d   : > { %v944_v26 = vadd.f32 %v943_v20, %v876_v21  ;;  %v1509_v27 = vpop.f32.mrb[16].mxu0  ;;  %v1545_v29 = vpop.f32.mrb[16].mxu1 }
 0x17e   : > { %v672_v30 = vpop.f32.mrb[17].mxu0  ;;  %v816_v32 = vpop.f32.mrb[17].mxu1  ;;  %v1005_v37 = vadd.f32 %v912_v28, %v911_v22  ;;  %v681_v46 = vadd.f32 %v1509_v27, %v2142_v45  ;;  %v825_v51 = vadd.f32 %v1545_v29, %v2142_v45 }
 0x17f   : > { %v945_v34 = vadd.f32 %v944_v26, %v877_v25  ;;  %v673_v35 = vadd.f32 %v2142_v45, %v672_v30  ;;  %v1510_v36 = vpop.f32.mrb[18].mxu0  ;;  %v1546_v38 = vpop.f32.mrb[18].mxu1  ;;  %v817_v53 = vadd.f32 %v2142_v45, %v816_v32 }
 0x180   : > { %v675_v39 = vpop.f32.mrb[19].mxu0  ;;  %v819_v43 = vpop.f32.mrb[19].mxu1  ;;  %v1006_v50 = vadd.f32 %v1005_v37, %v913_v31  ;;  %v684_v56 = vadd.f32 %v1510_v36, %v2142_v45  ;;  %v828_v61 = vadd.f32 %v1546_v38, %v2142_v45  ;;  %v881_v62 = vmax.f32 %v681_v46, 0.0 }
 0x181   : > { %v2185_v44 = vadd.f32 %v945_v34, %v878_v33  ;;  %v676_v48 = vadd.f32 %v2142_v45, %v675_v39  ;;  %v879_v55 = vmax.f32 %v673_v35, 0.0  ;;  %v820_v58 = vadd.f32 %v2142_v45, %v819_v43 }
 0x182   : > { %v915_v59 = vmax.f32 %v817_v53, 0.0  ;;  %v1007_v60 = vadd.f32 %v1006_v50, %v914_v40  ;;  %v917_v4 = vmax.f32 %v825_v51, 0.0  ;;  %v882_v7 = vmax.f32 %v684_v56, 0.0 }
 0x183   : > { %v880_v57 = vmax.f32 %v676_v48, 0.0  ;;  %v916_v1 = vmax.f32 %v820_v58, 0.0  ;;  %v918_v14 = vmax.f32 %v828_v61, 0.0 }
 0x184   : > { %v1008_v5 = vadd.f32 %v1007_v60, %v915_v59 }
 0x185   : > { %v953_v63 = vadd.f32 %v880_v57, %v879_v55  ;;  %v1513_v0 = vpop.f32.mrb[20].mxu0  ;;  %v1549_v2 = vpop.f32.mrb[20].mxu1 }
 0x186   : > { %v688_v3 = vpop.f32.mrb[21].mxu0  ;;  %v832_v6 = vpop.f32.mrb[21].mxu1  ;;  %v1009_v15 = vadd.f32 %v1008_v5, %v916_v1  ;;  %v697_v17 = vadd.f32 %v1513_v0, %v2142_v45  ;;  %v841_v24 = vadd.f32 %v1549_v2, %v2142_v45 }
 0x187   : > { %v954_v8 = vadd.f32 %v953_v63, %v881_v62  ;;  %v689_v9 = vadd.f32 %v2142_v45, %v688_v3  ;;  %v1514_v10 = vpop.f32.mrb[22].mxu0  ;;  %v833_v11 = vadd.f32 %v2142_v45, %v832_v6  ;;  %v1550_v12 = vpop.f32.mrb[22].mxu1 }
 0x188   : > { %v691_v13 = vpop.f32.mrb[23].mxu0  ;;  %v835_v16 = vpop.f32.mrb[23].mxu1  ;;  %v700_v22 = vadd.f32 %v1514_v10, %v2142_v45  ;;  %v1010_v23 = vadd.f32 %v1009_v15, %v917_v4  ;;  %v844_v30 = vadd.f32 %v1550_v12, %v2142_v45  ;;  %v885_v31 = vmax.f32 %v697_v17, 0.0 }
 0x189   : > { %v883_v19 = vmax.f32 %v689_v9, 0.0  ;;  %v955_v20 = vadd.f32 %v954_v8, %v882_v7  ;;  %v692_v21 = vadd.f32 %v2142_v45, %v691_v13  ;;  %v919_v27 = vmax.f32 %v833_v11, 0.0 }
 0x18a   : > { %v836_v28 = vadd.f32 %v2142_v45, %v835_v16  ;;  %v2201_v29 = vadd.f32 %v1010_v23, %v918_v14  ;;  %v921_v37 = vmax.f32 %v841_v24, 0.0  ;;  %v886_v39 = vmax.f32 %v700_v22, 0.0 }
 0x18b   : > { %v956_v25 = vadd.f32 %v955_v20, %v883_v19  ;;  %v884_v26 = vmax.f32 %v692_v21, 0.0  ;;  %v922_v53 = vmax.f32 %v844_v30, 0.0 }
 0x18c   : > { %v920_v34 = vmax.f32 %v836_v28, 0.0 }
 0x18d   : > { %v957_v32 = vadd.f32 %v956_v25, %v884_v26  ;;  %v1517_v33 = vpop.f32.mrb[24].mxu0  ;;  %v1553_v35 = vpop.f32.mrb[24].mxu1 }
 0x18e   : > { %v704_v36 = vpop.f32.mrb[25].mxu0  ;;  %v848_v38 = vpop.f32.mrb[25].mxu1  ;;  %v1018_v48 = vadd.f32 %v920_v34, %v919_v27  ;;  %v713_v57 = vadd.f32 %v1517_v33, %v2142_v45  ;;  %v857_v60 = vadd.f32 %v1553_v35, %v2142_v45 }
 0x18f   : > { %v958_v40 = vadd.f32 %v957_v32, %v885_v31  ;;  %v705_v43 = vadd.f32 %v2142_v45, %v704_v36  ;;  %v1518_v46 = vpop.f32.mrb[26].mxu0  ;;  %v1554_v50 = vpop.f32.mrb[26].mxu1  ;;  %v849_v61 = vadd.f32 %v2142_v45, %v848_v38  ;;  %v947_v38 = vrot.slane %v2185_v44, 4 }
 0x190   : > { %v707_v51 = vpop.f32.mrb[27].mxu0  ;;  %v851_v55 = vpop.f32.mrb[27].mxu1  ;;  %v1019_v59 = vadd.f32 %v1018_v48, %v921_v37  ;;  %v716_v63 = vadd.f32 %v1518_v46, %v2142_v45  ;;  %v860_v4 = vadd.f32 %v1554_v50, %v2142_v45  ;;  %v889_v5 = vmax.f32 %v713_v57, 0.0 }
 0x191   : > { %v959_v56 = vadd.f32 %v958_v40, %v886_v39  ;;  %v708_v58 = vadd.f32 %v2142_v45, %v707_v51  ;;  %v887_v62 = vmax.f32 %v705_v43, 0.0  ;;  %v852_v1 = vadd.f32 %v2142_v45, %v851_v55 }
 0x192   : > { %v923_v2 = vmax.f32 %v849_v61, 0.0  ;;  %v1020_v3 = vadd.f32 %v1019_v59, %v922_v53  ;;  %v925_v10 = vmax.f32 %v857_v60, 0.0  ;;  %v890_v12 = vmax.f32 %v716_v63, 0.0 }
 0x193   : > { %v888_v0 = vmax.f32 %v708_v58, 0.0  ;;  %v924_v8 = vmax.f32 %v852_v1, 0.0  ;;  %v926_v17 = vmax.f32 %v860_v4, 0.0  ;;  %v960_v40 = vrot.slane %v959_v56, 4 }
 0x194   : > { %v1021_v11 = vadd.f32 %v1020_v3, %v923_v2  ;;  %v934_v50 = vrot.slane %v2167_v42, 4  ;;  %v948_v58 = vadd.f32 %v947_v38, %v2185_v44  ;;  %v753_v59 = vadd.f32 %v2142_v45, %v2146_v49 }
 0x195   : > { %v966_v6 = vadd.f32 %v888_v0, %v887_v62  ;;  %v1521_v7 = vpop.f32.mrb[28].mxu0  ;;  %v961_v60 = vadd.f32 %v960_v40, %v959_v56  ;;  %v999_v0 = vrot.slane %v2179_v18, 4  ;;  %v756_v2 = vadd.f32 %v2142_v45, %v2151_v54 }
 0x196   : > { %v720_v9 = vpop.f32.mrb[29].mxu0  ;;  %v1022_v19 = vadd.f32 %v1021_v11, %v924_v8  ;;  %v729_v20 = vadd.f32 %v1521_v7, %v2142_v45  ;;  %v935_v63 = vadd.f32 %v934_v50, %v2167_v42  ;;  %v1012_v3 = vrot.slane %v2201_v29, 4 }
 0x197   : > { %v967_v13 = vadd.f32 %v966_v6, %v889_v5  ;;  %v721_v14 = vadd.f32 %v2142_v45, %v720_v9  ;;  %v1522_v15 = vpop.f32.mrb[30].mxu0  ;;  %v949_v6 = vrot.slane %v948_v58, 2  ;;  %v761_v49 = vadd.f32 %v2144_v47, %v2142_v45 }
 0x198   : > { %v723_v16 = vpop.f32.mrb[31].mxu0  ;;  %v1023_v24 = vadd.f32 %v1022_v19, %v925_v10  ;;  %v732_v26 = vadd.f32 %v1522_v15, %v2142_v45  ;;  %v893_v30 = vmax.f32 %v729_v20, 0.0  ;;  %v899_v56 = vmax.f32 %v753_v59, 0.0 }
 0x199   : > { %v891_v21 = vmax.f32 %v721_v14, 0.0  ;;  %v968_v22 = vadd.f32 %v967_v13, %v890_v12  ;;  %v724_v23 = vadd.f32 %v2142_v45, %v723_v16  ;;  %v962_v7 = vrot.slane %v961_v60, 2 }
 0x19a   : > { %v1024_v28 = vadd.f32 %v1023_v24, %v926_v17  ;;  %v894_v34 = vmax.f32 %v732_v26, 0.0  ;;  %v936_v9 = vrot.slane %v935_v63, 2  ;;  %v1000_v42 = vadd.f32 %v999_v0, %v2179_v18 }
 0x19b   : > { %v969_v25 = vadd.f32 %v968_v22, %v891_v21  ;;  %v892_v27 = vmax.f32 %v724_v23, 0.0  ;;  %v764_v11 = vadd.f32 %v2149_v52, %v2142_v45  ;;  %v900_v54 = vmax.f32 %v756_v2, 0.0 }
 0x19c   : > { %v1025_v44 = vrot.slane %v1024_v28, 4  ;;  %v1013_v12 = vadd.f32 %v1012_v3, %v2201_v29  ;;  %v950_v14 = vadd.f32 %v949_v6, %v948_v58  ;;  %v901_v16 = vmax.f32 %v761_v49, 0.0 }
 0x19d   : > { %v970_v31 = vadd.f32 %v969_v25, %v892_v27  ;;  %v1525_v32 = vpop.f32.mrb[32].mxu0  ;;  %v963_v17 = vadd.f32 %v962_v7, %v961_v60  ;;  %v937_v47 = vadd.f32 %v936_v9, %v935_v63  ;;  %v1001_v20 = vrot.slane %v1000_v42, 2 }
 0x19e   : > { %v736_v33 = vpop.f32.mrb[33].mxu0  ;;  %v745_v46 = vadd.f32 %v1525_v32, %v2142_v45  ;;  %v1026_v15 = vadd.f32 %v1025_v44, %v1024_v28  ;;  %v902_v22 = vmax.f32 %v764_v11, 0.0  ;;  %v1014_v23 = vrot.slane %v1013_v12, 2  ;;  %v1706_v11 = vld [vmem:[#allocation7 + $0x20] sm:$0xff]  }
 0x19f   : > { %v971_v35 = vadd.f32 %v970_v31, %v893_v30  ;;  %v737_v36 = vadd.f32 %v2142_v45, %v736_v33  ;;  %v1526_v37 = vpop.f32.mrb[34].mxu0  ;;  %v951_v18 = vrot.slane %v950_v14, 1  ;;  %v964_v26 = vrot.slane %v963_v17, 1  ;;  %1564 = vmatpush3.bf16.msra.mxu1 %v1706_v11 }
 0x1a0   : > { %v739_v39 = vpop.f32.mrb[35].mxu0  ;;  %v748_v55 = vadd.f32 %v1526_v37, %v2142_v45  ;;  %v897_v61 = vmax.f32 %v745_v46, 0.0  ;;  %v1027_v25 = vrot.slane %v1026_v15, 2  ;;  %v1002_v52 = vadd.f32 %v1001_v20, %v1000_v42  ;;  %1565 = vmatprep.subr.bf16.mxu1 %v1879_v41 }
 0x1a1   : > { %v972_v43 = vadd.f32 %v971_v35, %v894_v34  ;;  %v740_v48 = vadd.f32 %v2142_v45, %v739_v39  ;;  %v895_v53 = vmax.f32 %v737_v36, 0.0  ;;  %v938_v45 = vrot.slane %v937_v47, 1 }
 0x1a2   : > { %v898_v4 = vmax.f32 %v748_v55, 0.0  ;;  %v1015_v31 = vadd.f32 %v1014_v23, %v1013_v12  ;;  %v952_v32 = vadd.f32 %v951_v18, %v950_v14  ;;  %v1028_v28 = vadd.f32 %v1027_v25, %v1026_v15  ;;  %v1708_v12 = vld [vmem:[#allocation7 + $0x30] sm:$0xff]  }
 0x1a3   : > { %v973_v51 = vrot.slane %v972_v43, 4  ;;  %v896_v57 = vmax.f32 %v740_v48, 0.0  ;;  %v965_v33 = vadd.f32 %v964_v26, %v963_v17  ;;  %v939_v35 = vadd.f32 %v938_v45, %v937_v47 }
 0x1a4   : > { %v1003_v36 = vrot.slane %v1002_v52, 1  ;;  %v1016_v39 = vrot.slane %v1015_v31, 1  ;;  %v2236_v40 = vmul.f32 0.015625, %v952_v32 }
 0x1a5   : > { %v979_v62 = vadd.f32 %v896_v57, %v895_v53  ;;  %v974_v1 = vadd.f32 %v973_v51, %v972_v43  ;;  %v1029_v43 = vrot.slane %v1028_v28, 1  ;;  %v1033_v46 = vmul.f32 0.015625, %v965_v33 }
 0x1a6   : > { %v1031_v50 = vmul.f32 0.015625, %v939_v35  ;;  %v1004_v53 = vadd.f32 %v1003_v36, %v1002_v52  ;;  %v1017_v57 = vadd.f32 %v1016_v39, %v1015_v31  ;;  %v1040_v58 = vmul.f32 %v2236_v40, %v2236_v40 }
 0x1a7   : > { %v980_v5 = vadd.f32 %v979_v62, %v897_v61  ;;  %v975_v10 = vrot.slane %v974_v1, 2  ;;  %v1030_v59 = vadd.f32 %v1029_v43, %v1028_v28  ;;  %v1041_v61 = vmul.f32 %v1033_v46, %v1033_v46 }
 0x1a8   : > { %v1039_v62 = vmul.f32 %v1031_v50, %v1031_v50  ;;  %v1036_v63 = vmul.f32 0.015625, %v1004_v53  ;;  %v1037_v2 = vmul.f32 0.015625, %v1017_v57 }
 0x1a9   : > { %v981_v8 = vadd.f32 %v980_v5, %v898_v4  ;;  %v976_v21 = vadd.f32 %v975_v10, %v974_v1  ;;  %v1038_v3 = vmul.f32 0.015625, %v1030_v59 }
 0x1aa   : > { %v1056_v4 = vsel %vm1055_vm0, %v1040_v58, %v1039_v62  ;;  %v1044_v44 = vmul.f32 %v1036_v63, %v1036_v63 }
 0x1ab   : > { %v982_v13 = vadd.f32 %v981_v8, %v899_v56  ;;  %v977_v30 = vrot.slane %v976_v21, 1  ;;  %v1058_v6 = vsel %vm1057_vm1, %v1041_v61, %v1056_v4  ;;  %v1045_v56 = vmul.f32 %v1037_v2, %v1037_v2 }
 0x1ac   : > { %v1046_v8 = vmul.f32 %v1038_v3, %v1038_v3  ;;  %v1242_v4 = vlaneseq }
 0x1ad   : > { %v983_v19 = vadd.f32 %v982_v13, %v900_v54  ;;  %v978_v37 = vadd.f32 %v977_v30, %v976_v21  ;;  %v1707_v54 = vld [vmem:[#allocation7 + $0x28] sm:$0xff]   ;;  %v1709_v13 = vld [vmem:[#allocation7 + $0x38] sm:$0xff]  }
 0x1ae   : > { %1566 = vmatpush3.bf16.msra.mxu1 %v1707_v54 }
 0x1af   : > { %v984_v24 = vadd.f32 %v983_v19, %v901_v16  ;;  %v1034_v51 = vmul.f32 0.015625, %v978_v37  ;;  %1567 = vmatprep.subr.bf16.mxu1 %v1879_v41 }
 0x1b1   : > { %v985_v27 = vadd.f32 %v984_v24, %v902_v22  ;;  %v1042_v0 = vmul.f32 %v1034_v51, %v1034_v51 }
 0x1b2   : > { %1568 = vmatpush3.bf16.msra.mxu1 %v1708_v12 }
 0x1b3   : > { %v986_v29 = vrot.slane %v985_v27, 4  ;;  %v1060_v49 = vsel %vm1059_vm2, %v1042_v0, %v1058_v6  ;;  %1569 = vmatprep.subr.bf16.mxu1 %v1879_v41 }
 0x1b5   : > { %v987_v34 = vadd.f32 %v986_v29, %v985_v27 }
 0x1b6   : > { %1570 = vmatpush3.bf16.msra.mxu1 %v1709_v13 }
 0x1b7   : > { %v988_v38 = vrot.slane %v987_v34, 2 }
 0x1b9   : > { %v989_v48 = vadd.f32 %v988_v38, %v987_v34 }
 0x1bb   : > { %v990_v55 = vrot.slane %v989_v48, 1 }
 0x1bd   : > { %v991_v60 = vadd.f32 %v990_v55, %v989_v48 }
 0x1bf   : > { %v1035_v1 = vmul.f32 0.015625, %v991_v60 }
 0x1c1   : > { %v1043_v5 = vmul.f32 %v1035_v1, %v1035_v1 }
 0x1c3   : > { %v1062_v7 = vsel %vm1061_vm3, %v1043_v5, %v1060_v49  ;;  %v1243_v5 = vand.u32 127, %v1242_v4 }
 0x1c4   : > { %v1064_v9 = vsel %vm1063_vm4, %v1044_v44, %v1062_v7 }
 0x1c5   : > { %v1066_v42 = vsel %vm1065_vm5, %v1045_v56, %v1064_v9  ;;  %vm1244_vm8 = vcmp.lt.s32.totalorder %v1243_v5, 16 }
 0x1c6   : > { %v1068_v10 = vsel %vm1067_vm6, %v1046_v8, %v1066_v42 }
 0x1c7   : > { %1070 = vadd.xlane.f32.xlu0 %v1068_v10 }
 0x254   : > { %v1071_v14 = vpop.xlane.xlu0 %1070 }
 0x255   : > { %v1072_v15 = vadd.f32 1e-12, %v1071_v14 }
 0x257   : > { %1710 = vrsqrt.f32 %v1072_v15 }
 0x261   : > { %v1711_v16 = vpop.eup %1710 }
 0x262   : > { %v1075_v17 = vrot.slane %v1711_v16, 1  ;;  %v1076_v19 = vrot.slane %v1711_v16, 2  ;;  %v1077_v47 = vrot.slane %v1711_v16, 3  ;;  %v1078_v20 = vrot.slane %v1711_v16, 4 }
 0x263   : > { %v1079_v21 = vrot.slane %v1711_v16, 5  ;;  %v1080_v22 = vrot.slane %v1711_v16, 6  ;;  %v1081_v23 = vrot.slane %v1711_v16, 7  ;;  %v1090_v24 = vmul.f32 %v1711_v16, %v1031_v50 }
 0x264   : > { %v1091_v18 = vmul.f32 %v1075_v17, %v2236_v40  ;;  %v1092_v25 = vmul.f32 %v1076_v19, %v1033_v46  ;;  %v1093_v26 = vmul.f32 %v1077_v47, %v1034_v51  ;;  %v1094_v27 = vmul.f32 %v1078_v20, %v1035_v1 }
 0x265   : > { %v1095_v45 = vmul.f32 %v1079_v21, %v1036_v63  ;;  %v1096_v41 = vmul.f32 %v1080_v22, %v1037_v2  ;;  %v1097_v52 = vmul.f32 %v1081_v23, %v1038_v3  ;;  %v1098_v30 = vpack.c.bf16 %v1090_v24, %v1090_v24 }
 0x266   : > { %v1099_v29 = vpack.c.bf16 %v1091_v18, %v1091_v18  ;;  %v1100_v31 = vpack.c.bf16 %v1092_v25, %v1092_v25  ;;  %v1101_v32 = vpack.c.bf16 %v1093_v26, %v1093_v26  ;;  %v1102_v28 = vpack.c.bf16 %v1094_v27, %v1094_v27 }
 0x267   : > { %v1103_v33 = vpack.c.bf16 %v1095_v45, %v1095_v45  ;;  %v1104_v34 = vpack.c.bf16 %v1096_v41, %v1096_v41  ;;  %v1105_v35 = vpack.c.bf16 %v1097_v52, %v1097_v52  ;;  %v1130_v43 = vunpack.c.l.b16 %v1098_v30 }
 0x268   : > { %v1131_v36 = vunpack.c.l.b16 %v1099_v29  ;;  %v1132_v37 = vunpack.c.l.b16 %v1100_v31  ;;  %v1133_v38 = vunpack.c.l.b16 %v1101_v32  ;;  %v1134_v39 = vunpack.c.l.b16 %v1102_v28 }
 0x269   : > { %v1135_v40 = vunpack.c.l.b16 %v1103_v33  ;;  %v1136_v50 = vunpack.c.l.b16 %v1104_v34  ;;  %v1137_v51 = vunpack.c.l.b16 %v1105_v35 }
 0x26a   : > { %v1138_v46 = vrot.slane %v1131_v36, 7  ;;  %v1140_v48 = vrot.slane %v1132_v37, 6  ;;  %v1142_v55 = vrot.slane %v1133_v38, 5  ;;  %v1144_v58 = vrot.slane %v1134_v39, 4 }
 0x26b   : > { %v1146_v60 = vrot.slane %v1135_v40, 3  ;;  %v1148_v62 = vrot.slane %v1136_v50, 2  ;;  %v1150_v0 = vrot.slane %v1137_v51, 1 }
 0x26c   : > { %v1139_v53 = vsel %vm1055_vm0, %v1138_v46, %v1130_v43 }
 0x26d   : > { %v1141_v57 = vsel %vm1057_vm1, %v1140_v48, %v1139_v53 }
 0x26e   : > { %v1143_v59 = vsel %vm1059_vm2, %v1142_v55, %v1141_v57 }
 0x26f   : > { %v1145_v61 = vsel %vm1061_vm3, %v1144_v58, %v1143_v59 }
 0x270   : > { %v1147_v63 = vsel %vm1063_vm4, %v1146_v60, %v1145_v61 }
 0x271   : > { %v1149_v1 = vsel %vm1065_vm5, %v1148_v62, %v1147_v63 }
 0x272   : > { %v1151_v2 = vsel %vm1067_vm6, %v1150_v0, %v1149_v1 }
 0x273   : > { %v1152_v3 = vpack.c.b16 %v1151_v2, %v1151_v2 }
 0x275   : > { %1572 = vmatmul.mubr.bf16.vlgmr.msra.gmra.mrb[28].mxu1 %v1152_v3 }
 0x348   : > { %v1236_v6 = vpop.f32.mrb[28].mxu1 }
 0x349   : > { %v1573_v44 = vpop.f32.mrb[29].mxu1  ;;  %v1245_v49 = vsel %vm1244_vm8, %v1236_v6, -1e+30 }
 0x34a   : > { %1246 = vmax.xlane.f32.xlu0 %v1245_v49  ;;  %v1239_v56 = vpop.f32.mrb[30].mxu1 }
 0x34b   : > { %v1574_v7 = vpop.f32.mrb[31].mxu1 }
 0x3d7   : > { %v1247_v8 = vpop.xlane.xlu0 %1246 }
 0x3d8   : > { %v1248_v9 = vsub.f32 %v1245_v49, %v1247_v8 }
 0x3da   : > { %v1249_v42 = vmul.f32 1.442695, %v1248_v9 }
 0x3dc   : > { %1712 = vpow2.f32 %v1249_v42 }
 0x3e6   : > { %v1713_v10 = vpop.eup %1712 }
 0x3e7   : > { %1251 = vadd.xlane.f32.xlu1 %v1713_v10 }
 0x474   : > { %v1252_v11 = vpop.xlane.xlu1 %1251 }
 0x475   : > { %1714 = vrcp.f32 %v1252_v11 }
 0x47f   : > { %v1715_v54 = vpop.eup %1714 }
 0x480   : > { %v1254_v12 = vmul.f32 %v1715_v54, %v1713_v10 }
 0x482   : > { %1255 = vst [vmem:[%s244_s30] sm:$0xff] %v1254_v12 }
 0x483   : > { %1815 = shalt.err (!%p1812_p1)
}
 0x484   : > { %s1816_s8 = scalar_lea.hbm %s2264_s27, 128  ;;  %s1820_s28 = scalar_lea.hbm %s2312_s4, 256 }
 0x485   : > { %p1817_p13 = scmp.ne.s32.totalorder %s2264_s27, %s1816_s8  ;;  %p1821_p4 = scmp.lt.u32.totalorder %s2264_s27, %s2312_s4 }
 0x486   : > { %p1822_p5 = scmp.lt.u32.totalorder %s1820_s28, %s1816_s8  ;;  %p1824_p11 = scmp.lt.u32.totalorder %s1816_s8, %s2264_s27 }
 0x487   : > { %p1818_p6 = pnand %p1817_p13, %p2326_p0 }
 0x488   : > { %p1823_p8 = por %p1822_p5, %p1821_p4 }
 0x489   : > { %p1819_p10 = pneg %p1818_p6 }
 0x48a   : > { %p1825_p2 = por %p1824_p11, %p1823_p8 }
 0x48c   : > { %p1826_p3 = pnand %p1825_p2, %p1819_p10 }
 0x48e   : > { %1829 = shalt.err (!%p1826_p3)
}
 0x48f   : > { %1601 = dma.vmem_to_hbm [thread:$0]  (%p2326_p0), %s2266_s6, 128, %s2264_s27, %s1257_s20  }
 0x490 PF: > { %s1282_s11 = sand.u32 1, %s1860_s15   ;;  %p2327_p7 = scmp.ne.s32.totalorder %s2317_s22, 0 }
 0x491   : > { %p2328_p9 = scmp.ge.s32.totalorder %s1872_s18, 2  ;;  %s1283_s12 = scalar_lea.sflag [#allocation4], %s1282_s11 }
 0x493   : > { %p1615_p12 = pnand %p2328_p9, %p2327_p7 }
 0x495   : > { %1855 = dma.done.wait (!%p1615_p12), %s1283_s12, 128  }
 0x496   : > { %1857 = vsyncadd (!%p1615_p12), %s1283_s12, 4294967168  ;;  %p18_p1 = scmp.ge.s32.totalorder %s2023_s26, 4   ;;  %s2329_s15 = smov %s1864_s16 }
 0x497   : > { %s2330_s16 = smov %s1868_s17  ;;  %s2331_s17 = smov %s2039_s14 }
 0x498   : > { %s2332_s18 = smov %s2023_s26  ;;  %20 = sbr.rel (!%p18_p1) target bundleno = 6 (0x6), region = 89 }
 0x49f   :  { %1288 = vsyncpa [#allocation3], 1 }
 0x4a0   :  { %1290 = vsyncpa [#allocation3 + $0x1], 1 }
 0x4a1   :  { %1291 = vsyncpa [#allocation6], 1 }
 0x4a2   :  { %1292 = vsyncpa [#allocation4], 1 }
 0x4a3   :  { %1294 = vsyncpa [#allocation4 + $0x1], 1 }

</bundles_post_ra>
